<compile_context>
chip_gen: v5e
topology: v5e:2x2
jax: 0.10.0
libtpu: 0.0.40
codegen_flags: <defaults>
</compile_context>

<pallas_src>
import jax
import jax.numpy as jnp
from jax.experimental import pallas as pl
from jax.experimental.pallas import tpu as pltpu


def stem_kernel(x_ref, w_ref, b_ref, o_ref, pool_ref):
    # x_ref:    (1, Hs, Wo, KC)     bf16  folded input (space-to-depth + W-tap im2col)
    # w_ref:    (4, KC, Cpad)       bf16  per-H-tap weights, BN scale folded, Cout zero-padded
    # b_ref:    (1, Cpad)           f32   fused BN bias
    # o_ref:    (1, Hp, Wp, Cpad)   f32   stem output (after max-pool)
    # pool_ref: (Ho+2, Wo+2, Cpad)  f32   scratch: zero-halo buffer for the 3x3/s2/p1 max-pool
    _, Hs, Wo, KC = x_ref.shape
    _, Hp, Wp, Cpad = o_ref.shape
    Ho = 2 * Hp

    # ---- 7x7 / stride-2 conv: 4 MXU matmuls (one per folded H-tap), f32 accumulation.
    acc = jnp.dot(
        x_ref[0, 0:Ho, :, :].reshape(Ho * Wo, KC),
        w_ref[0],
        preferred_element_type=jnp.float32,
    )
    for a in range(1, 4):
        acc = acc + jnp.dot(
            x_ref[0, a:a + Ho, :, :].reshape(Ho * Wo, KC),
            w_ref[a],
            preferred_element_type=jnp.float32,
        )

    # ---- fused BatchNorm (eval) bias + ReLU (scale already folded into the weights).
    y = jnp.maximum(acc + b_ref[...], 0.0)                       # (Ho*Wo, Cpad) f32

    # ---- 3x3 / stride-2 / pad-1 max-pool (zero halo is exact because y >= 0).
    # Zero only the halo edges the pooling reads consume (cheap), not the whole scratch.
    pool_ref[0:1, :, :] = jnp.zeros((1, Wo + 2, Cpad), jnp.float32)          # top halo row
    pool_ref[Ho + 1:Ho + 2, :, :] = jnp.zeros((1, Wo + 2, Cpad), jnp.float32)  # bottom halo row
    pool_ref[:, 0:1, :] = jnp.zeros((Ho + 2, 1, Cpad), jnp.float32)          # left halo column
    pool_ref[1:Ho + 1, 1:Wo + 1, :] = y.reshape(Ho, Wo, Cpad)                # interior

    # W direction: 3-tap max + stride-2 subsample via sublane-strided reads.
    cm = pool_ref[:, pl.ds(0, Wp, 2), :]
    for b in (1, 2):
        cm = jnp.maximum(cm, pool_ref[:, pl.ds(b, Wp, 2), :])    # (Ho+2, Wp, Cpad)

    # H direction: even/odd split of the (major) row dim + 3-tap max.
    cm = cm.reshape(Hp + 1, 2, Wp, Cpad)
    ce, co = cm[:, 0], cm[:, 1]
    o_ref[0] = jnp.maximum(jnp.maximum(ce[:Hp], co[:Hp]), ce[1:Hp + 1])


def resnet_embeddings(pixel_values, conv_weight, bn_gamma, bn_beta,
                      bn_running_mean, bn_running_var, *, eps=1e-5):
    N, Cin, H, W = pixel_values.shape
    Cout, Cin_w, KH, KW = conv_weight.shape
    if Cin_w != Cin:
        # mirrors the module's num_channels check
        raise ValueError("Channel dimension of pixel values does not match the configuration.")
    assert KH == 7 and KW == 7
    assert H % 4 == 0 and W % 4 == 0
    assert Cout <= 128

    Ho, Wo = H // 2, W // 2           # conv output (k=7, s=2, p=3)
    Hp, Wp = Ho // 2, Wo // 2         # max-pool output (k=3, s=2, p=1)
    Hs, Ws = Ho + 3, Wo + 3           # space-to-depth spatial extents
    C4 = 4 * Cin                      # 2x2 stride phases folded into channels
    KC = 4 * C4                       # + 4 W-taps folded into the lane dim
    Cpad = 128                        # lane-dense output channels

    # ---- input: NCHW -> NHWC, pad by 3, space-to-depth, fold the 4 W-taps, cast to bf16.
    x = jnp.transpose(pixel_values, (0, 2, 3, 1))
    x = jnp.pad(x, ((0, 0), (3, 3), (3, 3), (0, 0)))
    x = x.reshape(N, Hs, 2, Ws, 2, Cin).transpose(0, 1, 3, 2, 4, 5).reshape(N, Hs, Ws, C4)
    x = jnp.concatenate([x[:, :, b:b + Wo, :] for b in range(4)], axis=-1)  # (N, Hs, Wo, KC)
    x = x.astype(jnp.bfloat16)

    # ---- weights: fold BN scale, rearrange (7,7,Cin,Cout) -> (4 H-taps, KC, Cout),
    #      zero-pad Cout -> 128, cast to bf16. Fused BN bias stays in f32.
    scale = bn_gamma / jnp.sqrt(bn_running_var + eps)
    bias = bn_beta - bn_running_mean * scale
    w = jnp.transpose(conv_weight, (2, 3, 1, 0)) * scale[None, None, None, :]  # HWIO, scale-fused
    w = jnp.pad(w, ((0, 1), (0, 1), (0, 0), (0, 0)))                           # 7x7 -> 8x8 (zeros)
    # (2a+di, 2b+dj, c, o) -> (a, b, di, dj, c, o) -> (a, b*C4 + di*2*Cin + dj*Cin + c, o)
    w = w.reshape(4, 2, 4, 2, Cin, Cout).transpose(0, 2, 1, 3, 4, 5).reshape(4, KC, Cout)
    w = jnp.pad(w, ((0, 0), (0, 0), (0, Cpad - Cout))).astype(jnp.bfloat16)
    b = jnp.pad(bias, (0, Cpad - Cout)).reshape(1, Cpad).astype(jnp.float32)

    out = pl.pallas_call(
        stem_kernel,
        out_shape=jax.ShapeDtypeStruct((N, Hp, Wp, Cpad), jnp.float32),
        grid_spec=pltpu.PrefetchScalarGridSpec(
            num_scalar_prefetch=0,
            grid=(N,),
            in_specs=[
                pl.BlockSpec((1, Hs, Wo, KC), lambda n: (n, 0, 0, 0)),
                pl.BlockSpec((4, KC, Cpad), lambda n: (0, 0, 0)),   # constant block: DMA'd once
                pl.BlockSpec((1, Cpad), lambda n: (0, 0)),          # constant block: DMA'd once
            ],
            out_specs=pl.BlockSpec((1, Hp, Wp, Cpad), lambda n: (n, 0, 0, 0)),
            scratch_shapes=[pltpu.VMEM((Ho + 2, Wo + 2, Cpad), jnp.float32)],
        ),
        compiler_params=pltpu.CompilerParams(
            dimension_semantics=("parallel",),
            vmem_limit_bytes=32 * 1024 * 1024,
        ),
    )(x, w, b)

    out = out[:, :, :, :Cout]                   # drop lane padding of the channel dim
    return jnp.transpose(out, (0, 3, 1, 2))     # NHWC -> NCHW (PyTorch convention)


def _reference(pixel_values, conv_weight, bn_gamma, bn_beta, bn_running_mean,
               bn_running_var, eps=1e-5):
    # Mirrors the PyTorch module (eval-mode BN), using the same bf16 rounding of the conv
    # operands as the kernel so the comparison is apples-to-apples.
    x = jnp.transpose(pixel_values, (0, 2, 3, 1))
    x = x.astype(jnp.bfloat16).astype(jnp.float32)
    scale = bn_gamma / jnp.sqrt(bn_running_var + eps)
    bias = bn_beta - bn_running_mean * scale
    w = jnp.transpose(conv_weight, (2, 3, 1, 0)) * scale[None, None, None, :]
    w = w.astype(jnp.bfloat16).astype(jnp.float32)
    y = jax.lax.conv_general_dilated(
        x, w, window_strides=(2, 2), padding=((3, 3), (3, 3)),
        dimension_numbers=("NHWC", "HWIO", "NHWC"),
        precision=jax.lax.Precision.HIGHEST)
    y = jnp.maximum(y + bias[None, None, None, :], 0.0)
    y = jax.lax.reduce_window(
        y, -jnp.inf, jax.lax.max,
        window_dimensions=(1, 3, 3, 1), window_strides=(1, 2, 2, 1),
        padding=((0, 0), (1, 1), (1, 1), (0, 0)))
    return jnp.transpose(y, (0, 3, 1, 2))


if __name__ == "__main__":
    # Small ResNetEmbeddings config: num_channels=3, embedding_size=16, 32x32 input.
    N, Cin, H, W = 2, 3, 32, 32
    Cout, K = 16, 7

    key = jax.random.PRNGKey(0)
    k_x, k_w, k_g, k_b, k_m, k_v = jax.random.split(key, 6)

    x = jax.random.normal(k_x, (N, Cin, H, W), dtype=jnp.float32)
    fan_in = Cin * K * K
    weight = jax.random.normal(k_w, (Cout, Cin, K, K), dtype=jnp.float32) / jnp.sqrt(fan_in)
    gamma = jax.random.uniform(k_g, (Cout,), minval=0.5, maxval=1.5, dtype=jnp.float32)
    beta = 0.1 * jax.random.normal(k_b, (Cout,), dtype=jnp.float32)
    running_mean = 0.1 * jax.random.normal(k_m, (Cout,), dtype=jnp.float32)
    running_var = jax.random.uniform(k_v, (Cout,), minval=0.5, maxval=1.5, dtype=jnp.float32)

    out = resnet_embeddings(x, weight, gamma, beta, running_mean, running_var)
    out = jax.block_until_ready(out)

    ref = _reference(x, weight, gamma, beta, running_mean, running_var)
    assert out.shape == (N, Cout, H // 4, W // 4), out.shape
    max_err = float(jnp.max(jnp.abs(out - ref)))
    assert max_err < 2e-3, max_err

    print("KERNEL_OK")
</pallas_src>

<mosaic_0001>
module attributes {stable_mosaic.version = 11 : i64} {
  func.func @stem_kernel(%arg0: i32, %arg1: memref<1x19x16x48xbf16, #tpu.memory_space<vmem>>, %arg2: memref<4x48x128xbf16, #tpu.memory_space<vmem>>, %arg3: memref<1x128xf32, #tpu.memory_space<vmem>>, %arg4: memref<1x8x8x128xf32, #tpu.memory_space<vmem>>, %arg5: memref<18x18x128xf32, #tpu.memory_space<vmem>>) attributes {dimension_semantics = [#tpu.dimension_semantics<parallel>], iteration_bounds = array<i64: 2>, scalar_prefetch = 0 : i64, scratch_operands = 1 : i64, tpu.core_type = #tpu.core_type<tc>, window_params = [{transform_indices = @transform_0, window_bounds = array<i64: 1, 19, 16, 48>}, {pipeline_mode = #tpu.pipeline_mode<synchronous>, transform_indices = @transform_1, window_bounds = array<i64: 4, 48, 128>}, {pipeline_mode = #tpu.pipeline_mode<synchronous>, transform_indices = @transform_2, window_bounds = array<i64: 1, 128>}, {transform_indices = @transform_3, window_bounds = array<i64: 1, 8, 8, 128>}]} {
    %c0 = arith.constant 0 : index
    %c0_0 = arith.constant 0 : index
    %c0_1 = arith.constant 0 : index
    %c0_2 = arith.constant 0 : index
    %0 = vector.load %arg1[%c0, %c0_0, %c0_1, %c0_2] : memref<1x19x16x48xbf16, #tpu.memory_space<vmem>>, vector<1x16x16x48xbf16>
    %1 = vector.shape_cast %0 : vector<1x16x16x48xbf16> to vector<16x16x48xbf16>
    %2 = vector.shape_cast %1 : vector<16x16x48xbf16> to vector<256x48xbf16>
    %c0_3 = arith.constant 0 : index
    %c0_4 = arith.constant 0 : index
    %c0_5 = arith.constant 0 : index
    %3 = vector.load %arg2[%c0_3, %c0_4, %c0_5] : memref<4x48x128xbf16, #tpu.memory_space<vmem>>, vector<1x48x128xbf16>
    %4 = vector.shape_cast %3 : vector<1x48x128xbf16> to vector<48x128xbf16>
    %cst = arith.constant dense<0.000000e+00> : vector<256x128xf32>
    %5 = tpu.matmul %2, %4, %cst {dimension_numbers = #tpu.dot_dimension_numbers<[1], [0], [0], [1], [0, 0, 1, 1], [], []>} : vector<256x48xbf16>, vector<48x128xbf16>, vector<256x128xf32> -> vector<256x128xf32>
    %c0_6 = arith.constant 0 : index
    %c1 = arith.constant 1 : index
    %c0_7 = arith.constant 0 : index
    %c0_8 = arith.constant 0 : index
    %6 = vector.load %arg1[%c0_6, %c1, %c0_7, %c0_8] : memref<1x19x16x48xbf16, #tpu.memory_space<vmem>>, vector<1x16x16x48xbf16>
    %7 = vector.shape_cast %6 : vector<1x16x16x48xbf16> to vector<16x16x48xbf16>
    %8 = vector.shape_cast %7 : vector<16x16x48xbf16> to vector<256x48xbf16>
    %c1_9 = arith.constant 1 : index
    %c0_10 = arith.constant 0 : index
    %c0_11 = arith.constant 0 : index
    %9 = vector.load %arg2[%c1_9, %c0_10, %c0_11] : memref<4x48x128xbf16, #tpu.memory_space<vmem>>, vector<1x48x128xbf16>
    %10 = vector.shape_cast %9 : vector<1x48x128xbf16> to vector<48x128xbf16>
    %cst_12 = arith.constant dense<0.000000e+00> : vector<256x128xf32>
    %11 = tpu.matmul %8, %10, %cst_12 {dimension_numbers = #tpu.dot_dimension_numbers<[1], [0], [0], [1], [0, 0, 1, 1], [], []>} : vector<256x48xbf16>, vector<48x128xbf16>, vector<256x128xf32> -> vector<256x128xf32>
    %12 = arith.addf %5, %11 : vector<256x128xf32>
    %c0_13 = arith.constant 0 : index
    %c2 = arith.constant 2 : index
    %c0_14 = arith.constant 0 : index
    %c0_15 = arith.constant 0 : index
    %13 = vector.load %arg1[%c0_13, %c2, %c0_14, %c0_15] : memref<1x19x16x48xbf16, #tpu.memory_space<vmem>>, vector<1x16x16x48xbf16>
    %14 = vector.shape_cast %13 : vector<1x16x16x48xbf16> to vector<16x16x48xbf16>
    %15 = vector.shape_cast %14 : vector<16x16x48xbf16> to vector<256x48xbf16>
    %c2_16 = arith.constant 2 : index
    %c0_17 = arith.constant 0 : index
    %c0_18 = arith.constant 0 : index
    %16 = vector.load %arg2[%c2_16, %c0_17, %c0_18] : memref<4x48x128xbf16, #tpu.memory_space<vmem>>, vector<1x48x128xbf16>
    %17 = vector.shape_cast %16 : vector<1x48x128xbf16> to vector<48x128xbf16>
    %cst_19 = arith.constant dense<0.000000e+00> : vector<256x128xf32>
    %18 = tpu.matmul %15, %17, %cst_19 {dimension_numbers = #tpu.dot_dimension_numbers<[1], [0], [0], [1], [0, 0, 1, 1], [], []>} : vector<256x48xbf16>, vector<48x128xbf16>, vector<256x128xf32> -> vector<256x128xf32>
    %19 = arith.addf %12, %18 : vector<256x128xf32>
    %c0_20 = arith.constant 0 : index
    %c3 = arith.constant 3 : index
    %c0_21 = arith.constant 0 : index
    %c0_22 = arith.constant 0 : index
    %20 = vector.load %arg1[%c0_20, %c3, %c0_21, %c0_22] : memref<1x19x16x48xbf16, #tpu.memory_space<vmem>>, vector<1x16x16x48xbf16>
    %21 = vector.shape_cast %20 : vector<1x16x16x48xbf16> to vector<16x16x48xbf16>
    %22 = vector.shape_cast %21 : vector<16x16x48xbf16> to vector<256x48xbf16>
    %c3_23 = arith.constant 3 : index
    %c0_24 = arith.constant 0 : index
    %c0_25 = arith.constant 0 : index
    %23 = vector.load %arg2[%c3_23, %c0_24, %c0_25] : memref<4x48x128xbf16, #tpu.memory_space<vmem>>, vector<1x48x128xbf16>
    %24 = vector.shape_cast %23 : vector<1x48x128xbf16> to vector<48x128xbf16>
    %cst_26 = arith.constant dense<0.000000e+00> : vector<256x128xf32>
    %25 = tpu.matmul %22, %24, %cst_26 {dimension_numbers = #tpu.dot_dimension_numbers<[1], [0], [0], [1], [0, 0, 1, 1], [], []>} : vector<256x48xbf16>, vector<48x128xbf16>, vector<256x128xf32> -> vector<256x128xf32>
    %26 = arith.addf %19, %25 : vector<256x128xf32>
    %c0_27 = arith.constant 0 : index
    %c0_28 = arith.constant 0 : index
    %27 = vector.load %arg3[%c0_27, %c0_28] : memref<1x128xf32, #tpu.memory_space<vmem>>, vector<1x128xf32>
    %28 = vector.broadcast %27 : vector<1x128xf32> to vector<256x128xf32>
    %29 = arith.addf %26, %28 : vector<256x128xf32>
    %cst_29 = arith.constant 0.000000e+00 : f32
    %30 = vector.broadcast %cst_29 : f32 to vector<256x128xf32>
    %31 = arith.maximumf %29, %30 : vector<256x128xf32>
    %cst_30 = arith.constant 0.000000e+00 : f32
    %32 = vector.broadcast %cst_30 : f32 to vector<1x18x128xf32>
    %c0_31 = arith.constant 0 : index
    %c0_32 = arith.constant 0 : index
    %c0_33 = arith.constant 0 : index
    %33 = vector.load %arg5[%c0_31, %c0_32, %c0_33] : memref<18x18x128xf32, #tpu.memory_space<vmem>>, vector<1x18x128xf32>
    tpu.vector_store %arg5[%c0_31, %c0_32, %c0_33], %32 {strides = array<i32>} : memref<18x18x128xf32, #tpu.memory_space<vmem>>, vector<1x18x128xf32>,
    %cst_34 = arith.constant 0.000000e+00 : f32
    %34 = vector.broadcast %cst_34 : f32 to vector<1x18x128xf32>
    %c17 = arith.constant 17 : index
    %c0_35 = arith.constant 0 : index
    %c0_36 = arith.constant 0 : index
    %35 = vector.load %arg5[%c17, %c0_35, %c0_36] : memref<18x18x128xf32, #tpu.memory_space<vmem>>, vector<1x18x128xf32>
    tpu.vector_store %arg5[%c17, %c0_35, %c0_36], %34 {strides = array<i32>} : memref<18x18x128xf32, #tpu.memory_space<vmem>>, vector<1x18x128xf32>,
    %cst_37 = arith.constant 0.000000e+00 : f32
    %36 = vector.broadcast %cst_37 : f32 to vector<18x1x128xf32>
    %c0_38 = arith.constant 0 : index
    %c0_39 = arith.constant 0 : index
    %c0_40 = arith.constant 0 : index
    %37 = vector.load %arg5[%c0_38, %c0_39, %c0_40] : memref<18x18x128xf32, #tpu.memory_space<vmem>>, vector<18x1x128xf32>
    tpu.vector_store %arg5[%c0_38, %c0_39, %c0_40], %36 {strides = array<i32>} : memref<18x18x128xf32, #tpu.memory_space<vmem>>, vector<18x1x128xf32>,
    %38 = vector.shape_cast %31 : vector<256x128xf32> to vector<16x16x128xf32>
    %c1_41 = arith.constant 1 : index
    %c1_42 = arith.constant 1 : index
    %c0_43 = arith.constant 0 : index
    %39 = vector.load %arg5[%c1_41, %c1_42, %c0_43] : memref<18x18x128xf32, #tpu.memory_space<vmem>>, vector<16x16x128xf32>
    tpu.vector_store %arg5[%c1_41, %c1_42, %c0_43], %38 {strides = array<i32>} : memref<18x18x128xf32, #tpu.memory_space<vmem>>, vector<16x16x128xf32>,
    %c0_44 = arith.constant 0 : index
    %c0_45 = arith.constant 0 : index
    %c0_46 = arith.constant 0 : index
    %40 = tpu.strided_load %arg5[%c0_44, %c0_45, %c0_46] {strides = array<i32: 1, 2, 1>} : memref<18x18x128xf32, #tpu.memory_space<vmem>>, vector<18x8x128xf32>
    %c0_47 = arith.constant 0 : index
    %c1_48 = arith.constant 1 : index
    %c0_49 = arith.constant 0 : index
    %41 = tpu.strided_load %arg5[%c0_47, %c1_48, %c0_49] {strides = array<i32: 1, 2, 1>} : memref<18x18x128xf32, #tpu.memory_space<vmem>>, vector<18x8x128xf32>
    %42 = arith.maximumf %40, %41 : vector<18x8x128xf32>
    %c0_50 = arith.constant 0 : index
    %c2_51 = arith.constant 2 : index
    %c0_52 = arith.constant 0 : index
    %43 = tpu.strided_load %arg5[%c0_50, %c2_51, %c0_52] {strides = array<i32: 1, 2, 1>} : memref<18x18x128xf32, #tpu.memory_space<vmem>>, vector<18x8x128xf32>
    %44 = arith.maximumf %42, %43 : vector<18x8x128xf32>
    %45 = vector.shape_cast %44 : vector<18x8x128xf32> to vector<9x2x8x128xf32>
    %46 = vector.extract_strided_slice %45 {offsets = [0, 0, 0, 0], sizes = [9, 1, 8, 128], strides = [1, 1, 1, 1]} : vector<9x2x8x128xf32> to vector<9x1x8x128xf32>
    %47 = vector.shape_cast %46 : vector<9x1x8x128xf32> to vector<9x8x128xf32>
    %48 = vector.extract_strided_slice %45 {offsets = [0, 1, 0, 0], sizes = [9, 1, 8, 128], strides = [1, 1, 1, 1]} : vector<9x2x8x128xf32> to vector<9x1x8x128xf32>
    %49 = vector.shape_cast %48 : vector<9x1x8x128xf32> to vector<9x8x128xf32>
    %50 = vector.extract_strided_slice %47 {offsets = [0, 0, 0], sizes = [8, 8, 128], strides = [1, 1, 1]} : vector<9x8x128xf32> to vector<8x8x128xf32>
    %51 = vector.extract_strided_slice %49 {offsets = [0, 0, 0], sizes = [8, 8, 128], strides = [1, 1, 1]} : vector<9x8x128xf32> to vector<8x8x128xf32>
    %52 = arith.maximumf %50, %51 : vector<8x8x128xf32>
    %53 = vector.extract_strided_slice %47 {offsets = [1, 0, 0], sizes = [8, 8, 128], strides = [1, 1, 1]} : vector<9x8x128xf32> to vector<8x8x128xf32>
    %54 = arith.maximumf %52, %53 : vector<8x8x128xf32>
    %c0_53 = arith.constant 0 : index
    %c0_54 = arith.constant 0 : index
    %c0_55 = arith.constant 0 : index
    %c0_56 = arith.constant 0 : index
    %55 = vector.load %arg4[%c0_53, %c0_54, %c0_55, %c0_56] : memref<1x8x8x128xf32, #tpu.memory_space<vmem>>, vector<1x8x8x128xf32>
    %56 = vector.shape_cast %55 : vector<1x8x8x128xf32> to vector<8x8x128xf32>
    %57 = vector.shape_cast %54 : vector<8x8x128xf32> to vector<1x8x8x128xf32>
    tpu.vector_store %arg4[%c0_53, %c0_54, %c0_55, %c0_56], %57 {strides = array<i32>} : memref<1x8x8x128xf32, #tpu.memory_space<vmem>>, vector<1x8x8x128xf32>,
    return
  }
  func.func @transform_0(%arg0: i32) -> (i32, i32, i32, i32) {
    %c0_i32 = arith.constant 0 : i32
    %c0_i32_0 = arith.constant 0 : i32
    %c0_i32_1 = arith.constant 0 : i32
    %c0_i32_2 = arith.constant 0 : i32
    return %arg0, %c0_i32, %c0_i32_0, %c0_i32_1 : i32, i32, i32, i32
  }
  func.func @transform_1(%arg0: i32) -> (i32, i32, i32) {
    %c0_i32 = arith.constant 0 : i32
    %c0_i32_0 = arith.constant 0 : i32
    %c0_i32_1 = arith.constant 0 : i32
    %c0_i32_2 = arith.constant 0 : i32
    return %c0_i32, %c0_i32_0, %c0_i32_1 : i32, i32, i32
  }
  func.func @transform_2(%arg0: i32) -> (i32, i32) {
    %c0_i32 = arith.constant 0 : i32
    %c0_i32_0 = arith.constant 0 : i32
    %c0_i32_1 = arith.constant 0 : i32
    return %c0_i32, %c0_i32_0 : i32, i32
  }
  func.func @transform_3(%arg0: i32) -> (i32, i32, i32, i32) {
    %c0_i32 = arith.constant 0 : i32
    %c0_i32_0 = arith.constant 0 : i32
    %c0_i32_1 = arith.constant 0 : i32
    %c0_i32_2 = arith.constant 0 : i32
    return %arg0, %c0_i32, %c0_i32_0, %c0_i32_1 : i32, i32, i32, i32
  }
}

</mosaic_0001>

<bundles_post_ra>
// kernel: tpu_custom_call.1
= control target key start
LH: loop header
LB: loop body
LE: loop exit
PB: predicated region body
PF: predicated region fallthrough
CT: control target
= control target key end

     0   :  { %8 = vsyncpa [#allocation4], 0  ;;  %s2865_s0 = inlined_call_operand.hbm [shape: bf16[2,19,16,48], index: 0, kind: input, shape index: {}]   ;;  %s2866_s1 = inlined_call_operand.hbm [shape: bf16[4,48,128], index: 1, kind: input, shape index: {}]   ;;  %s2867_s2 = inlined_call_operand.vmem [shape: f32[1,128], index: 2, kind: input, shape index: {}]   ;;  %s2868_s3 = inlined_call_operand.hbm [shape: f32[2,8,8,128], index: 3, kind: output, shape index: {}]  }
   0x1   :  { %10 = vsyncpa [#allocation4 + $0x1], 0 }
   0x2   :  { %11 = vsyncpa [#allocation7], 0 }
   0x3   :  { %12 = vsyncpa [#allocation5], 0 }
   0x4   :  { %14 = vsyncpa [#allocation5 + $0x1], 0  ;;  %s2534_s12 = smov 0   ;;  %s2536_s13 = smov 0  }
   0x5   :  { %s2538_s14 = smov 0   ;;  %s2540_s15 = smov 0  }
   0x6 LB: > { %s2555_s16 = sadd.s32 4294967295, %s2506_s15   ;;  %s1756_s17 = sadd.s32 4294967294, %s2506_s15   ;;  %s2506_s15 = sphi %s2540_s15, %s2880_s15   ;;  %s2502_s14 = sphi %s2538_s14, %s2879_s14   ;;  %s2498_s13 = sphi %s2536_s13, %s2878_s13   ;;  %s2494_s12 = sphi %s2534_s12, %s2877_s12  }
   0x7   : > { %p40_p0 = scmp.ne.s32.totalorder %s2498_s13, %s2494_s12  ;;  %p41_p1 = scmp.eq.s32.totalorder %s2555_s16, 0 }
   0x8   : > { %p106_p2 = scmp.eq.s32.totalorder %s2555_s16, 1  ;;  %p112_p3 = scmp.eq.s32.totalorder %s1756_s17, 1 }
   0x9   : > { %p2564_p4 = por %p41_p1, %p40_p0  ;;  %p1757_p5 = scmp.ge.s32.totalorder %s2506_s15, 1 }
   0xa   : > { %p2569_p6 = por %p112_p3, %p40_p0  ;;  %p119_p7 = scmp.lt.s32.totalorder %s2506_s15, 3 }
   0xb   : > { %s130_s22 = sshll.u32 %s2866_s1, 4  ;;  %s2508_s24 = smov [#allocation6]   ;;  %s131_s22 = int_to_ptr.hbm [resolvable:$true] %s130_s22 }
   0xc   : > { %p2577_p8 = pnand %p1757_p5, %p119_p7  ;;  %s132_s25 = sshll.u32 %s2508_s24, 4  ;;  %s133_s25 = int_to_ptr.vmem [resolvable:$true] %s132_s25 }
   0xd   : > { %s2587_s26 = sadd.s32 1, %s2506_s15   ;;  %s2869_s27 = smov 64  }
   0xe   : > { %p2321_p9 = pneg %p2577_p8  ;;  %s2510_s28 = smov 4  }
   0xf   : > { %s24_s29 = ssub.s32 %s2506_s15, %s2587_s26  ;;  %s27_s30 = sadd.s32 1, %s2502_s14 }
  0x10   : > { %p2322_p10 = pnand %p2321_p9, %p41_p1  ;;  %p25_p12 = scmp.eq.s32.totalorder %s24_s29, 0 }
  0x11   : > { %p34_p13 = scmp.ne.s32.totalorder %s2502_s14, %s2498_s13  ;;  %p35_p0 = scmp.eq.s32.totalorder %s2506_s15, 0 }
  0x12   : > { %2324 = dma.hbm_to_vmem [thread:$0]  (!%p2322_p10), %s131_s22, 1536, %s133_s25, [#allocation7], %s2869_s27, %s2869_s27, %s2510_s28  }
  0x13   : > { %p2334_p3 = scmp.lt.s32.totalorder %s2506_s15, 2  ;;  %p36_p5 = por %p35_p0, %p34_p13 }
  0x14   : > { %s2600_s4 = scalar_select %p25_p12, %s2502_s14, %s27_s30  }
  0x15   : > { %p2604_p7 = por %p106_p2, %p34_p13  ;;  %s149_s6 = sand.u32 1, %s2502_s14  }
  0x16   : > { %s2311_s7 = smul.u32 152, %s2506_s15  ;;  %p2613_p9 = pnand %p2334_p3, %p36_p5 }
  0x17   : > { %s2310_s8 = smul.u32 152, %s149_s6  ;;  %s150_s24 = scalar_lea.sflag [#allocation4], %s149_s6 }
  0x18   : > { %s158_s11 = scalar_lea.hbm %s2865_s0, %s2311_s7  ;;  %p2410_p10 = pneg %p2613_p9 }
  0x19   : > { %s159_s20 = sshll.u32 %s158_s11, 4  ;;  %s153_s21 = scalar_lea.vmem [#allocation3], %s2310_s8  ;;  %s160_s20 = int_to_ptr.hbm [resolvable:$true] %s159_s20 }
  0x1a   : > { %s161_s22 = sshll.u32 %s153_s21, 4  ;;  %s2406_s25 = sshra.s32 %s160_s20, 4  ;;  %s162_s22 = int_to_ptr.vmem [resolvable:$true] %s161_s22  ;;  %s2407_s25 = int_to_ptr.hbm [resolvable:$true] %s2406_s25 }
  0x1b   : > { %s2408_s29 = scalar_lea.hbm %s2407_s25, 152  ;;  %s2413_s9 = scalar_lea.hbm %s2865_s0, 304 }
  0x1c   : > { %p2409_p2 = scmp.ne.s32.totalorder %s2407_s25, %s2408_s29  ;;  %p2414_p0 = scmp.lt.s32.totalorder %s2407_s25, %s2865_s0 }
  0x1d   : > { %p2415_p3 = scmp.lt.s32.totalorder %s2413_s9, %s2408_s29 }
  0x1e   : > { %p2411_p12 = pnand %p2410_p10, %p2409_p2 }
  0x1f   : > { %p2416_p5 = por %p2415_p3, %p2414_p0 }
  0x20   : > { %p2412_p13 = pneg %p2411_p12 }
  0x22   : > { %p2417_p11 = pnand %p2416_p5, %p2412_p13 }
  0x24   : > { %2420 = shalt.err (!%p2417_p11)
}
  0x25   : > { %s2875_s6 = smov 64   ;;  %173 = sbr.rel (%p2577_p8) target bundleno = 465 (0x1d1), region = 32 }
  0x26   : > { %2328 = dma.hbm_to_vmem [thread:$0]  (!%p2613_p9), %s160_s20, 2432, %s162_s22, %s150_s24, %s2875_s6, %s2875_s6, %s2510_s28  }
  0x27   : > { %s2633_s8 = sand.u32 (!%p2577_p8), 1, %s2498_s13  }
  0x28   : > { %s2312_s27 = smul.u32 (!%p2577_p8), 152, %s2633_s8  ;;  %s176_s11 = scalar_lea.sflag (!%p2577_p8), [#allocation4], %s2633_s8 }
  0x2a   : > { %s2637_s21 = scalar_lea.vmem [#allocation3], %s2312_s27 }
  0x2b   : > { %2481 = dma.done.wait (%p2564_p4), %s176_s11, 2432  }
  0x2c   : > { %2483 = vsyncadd (%p2564_p4), %s176_s11, 4294964864 }
  0x2d   : > { %2485 = dma.done.wait (%p41_p1), [#allocation7], 1536  }
  0x2e   : > { %2487 = vsyncadd (%p41_p1), [#allocation7], 4294965760  ;;  %v2511_v0 = vmov 0.0   ;;  %v2270_v1 = vld [vmem:[#allocation6 + $0x28] sm:$0xff]  ;;  %v2251_v2 = vld [vmem:[#allocation6 + $0x10] sm:$0xff]  ;;  %vm385_vm0 = vcmask 392192  }
  0x2f   : > { %1440 = vst [vmem:[#allocation2] sm:$0xff] %v2511_v0  ;;  %v2289_v3 = vld [vmem:[#allocation6 + $0x40] sm:$0xff]  ;;  %v2308_v4 = vld [vmem:[#allocation6 + $0x58] sm:$0xff]  ;;  %439 = vmatpush.bf16.msra.mxu0 %v2270_v1  ;;  %674 = vmatpush.bf16.msra.mxu1 %v2251_v2  ;;  %v2250_v6 = vld [vmem:[#allocation6 + $0x8] sm:$0xff]  ;;  %s1763_s28 = sshll.u32 %s2633_s8, 6  ;;  %s2309_s20 = sshll.u32 %s2555_s16, 6 }
  0x30   : > { %1441 = vst [vmem:[#allocation2 + $0x8] sm:$0xff] %v2511_v0  ;;  %v2269_v5 = vld [vmem:[#allocation6 + $0x20] sm:$0xff]  ;;  %949 = vmatpush.bf16.msra.mxu2 %v2289_v3  ;;  %1256 = vmatpush.bf16.msra.mxu3 %v2308_v4  ;;  %v2288_v7 = vld [vmem:[#allocation6 + $0x38] sm:$0xff]  ;;  %v2307_v8 = vld [vmem:[#allocation6 + $0x50] sm:$0xff]  ;;  %s2758_s17 = scalar_lea.vmem [#allocation8], %s1763_s28  ;;  %s1669_s25 = scalar_lea.hbm %s2868_s3, %s2309_s20 }
  0x31   : > { %1442 = vst [vmem:[#allocation2 + $0x10] sm:$0x3] %v2511_v0  ;;  %v2268_v9 = vld [vmem:[#allocation6 + $0x18] sm:$0xff]  ;;  %v2249_v10 = vld [vmem:[#allocation6] sm:$0xff]  ;;  %v2287_v11 = vld [vmem:[#allocation6 + $0x30] sm:$0xff]  ;;  %s1670_s29 = sshll.u32 %s2758_s17, 4  ;;  %s1671_s29 = int_to_ptr.vmem [resolvable:$true] %s1670_s29 }
  0x32   : > { %1448 = vst [vmem:[#allocation2 + $0x18] sm:$0x1] %v2511_v0  ;;  %v2306_v12 = vld [vmem:[#allocation6 + $0x48] sm:$0xff]  ;;  %v2252_v13 = vld [vmem:[%s2637_s21 + $0x8] sm:$0xff]  ;;  %v2271_v15 = vld [vmem:[%s2637_s21 + $0x10] sm:$0xff]  ;;  %s1672_s30 = sshll.u32 %s1669_s25, 4  ;;  %s1673_s30 = int_to_ptr.hbm [resolvable:$true] %s1672_s30 }
  0x33   : > { %1449 = vst [vmem:[#allocation2 + $0x30] sm:$0x1] %v2511_v0  ;;  %440 = vmatpush.bf16.msra.mxu0 %v2269_v5  ;;  %675 = vmatpush.bf16.msra.mxu1 %v2250_v6  ;;  %v2233_v14 = vld [vmem:[%s2637_s21] sm:$0xff]  ;;  %v2290_v16 = vld [vmem:[%s2637_s21 + $0x18] sm:$0xff]  ;;  %v2253_v17 = vld [vmem:[%s2637_s21 + $0x10] sm:$0xff]  ;;  %s1658_s16 = scalar_lea.sflag [#allocation5], %s2633_s8 }
  0x34   : > { %1450 = vst [vmem:[#allocation2 + $0x48] sm:$0x1] %v2511_v0  ;;  %950 = vmatpush.bf16.msra.mxu2 %v2288_v7  ;;  %1257 = vmatpush.bf16.msra.mxu3 %v2307_v8  ;;  %v2234_v18 = vld [vmem:[%s2637_s21 + $0x8] sm:$0xff]  ;;  %v2272_v19 = vld [vmem:[%s2637_s21 + $0x18] sm:$0xff]  ;;  %v2291_v20 = vld [vmem:[%s2637_s21 + $0x20] sm:$0xff]  ;;  %s2450_s7 = sshra.s32 %s1673_s30, 4  ;;  %s2451_s7 = int_to_ptr.hbm [resolvable:$true] %s2450_s7 }
  0x35   : > { %1451 = vst [vmem:[#allocation2 + $0x60] sm:$0x1] %v2511_v0  ;;  %v2254_v21 = vld [vmem:[%s2637_s21 + $0x18] sm:$0xff]  ;;  %v2235_v22 = vld [vmem:[%s2637_s21 + $0x10] sm:$0xff]  ;;  %v2273_v23 = vld [vmem:[%s2637_s21 + $0x20] sm:$0xff]  ;;  %s2452_s9 = scalar_lea.hbm %s2451_s7, 64  ;;  %p2457_p11 = scmp.lt.s32.totalorder %s2451_s7, %s2868_s3 }
  0x36   : > { %1452 = vst [vmem:[#allocation2 + $0x78] sm:$0x1] %v2511_v0  ;;  %v2292_v24 = vld [vmem:[%s2637_s21 + $0x28] sm:$0xff]  ;;  %v2255_v25 = vld [vmem:[%s2637_s21 + $0x20] sm:$0xff]  ;;  %v2236_v26 = vld [vmem:[%s2637_s21 + $0x18] sm:$0xff]  ;;  %p2453_p1 = scmp.ne.s32.totalorder %s2451_s7, %s2452_s9  ;;  %s2456_s27 = scalar_lea.hbm %s2868_s3, 128 }
  0x37   : > { %1453 = vst [vmem:[#allocation2 + $0x90] sm:$0x1] %v2511_v0  ;;  %441 = vmatpush.bf16.msra.mxu0 %v2268_v9  ;;  %676 = vmatpush.bf16.msra.mxu1 %v2249_v10  ;;  %v2274_v27 = vld [vmem:[%s2637_s21 + $0x28] sm:$0xff]  ;;  %v2293_v28 = vld [vmem:[%s2637_s21 + $0x30] sm:$0xff]  ;;  %v2237_v30 = vld [vmem:[%s2637_s21 + $0x20] sm:$0xff]  ;;  %p2458_p9 = scmp.lt.s32.totalorder %s2456_s27, %s2452_s9 }
  0x38   : > { %1454 = vst [vmem:[#allocation2 + $0xa8] sm:$0x1] %v2511_v0  ;;  %951 = vmatpush.bf16.msra.mxu2 %v2287_v11  ;;  %1258 = vmatpush.bf16.msra.mxu3 %v2306_v12  ;;  %v2256_v29 = vld [vmem:[%s2637_s21 + $0x28] sm:$0xff]  ;;  %v2275_v31 = vld [vmem:[%s2637_s21 + $0x30] sm:$0xff]  ;;  %v2294_v32 = vld [vmem:[%s2637_s21 + $0x38] sm:$0xff]  ;;  %p2454_p4 = pnand %p2453_p1, %p2604_p7 }
  0x39   : > { %1455 = vst [vmem:[#allocation2 + $0xc0] sm:$0x1] %v2511_v0  ;;  %v2257_v33 = vld [vmem:[%s2637_s21 + $0x30] sm:$0xff]  ;;  %v2238_v34 = vld [vmem:[%s2637_s21 + $0x28] sm:$0xff]  ;;  %v2276_v35 = vld [vmem:[%s2637_s21 + $0x38] sm:$0xff]  ;;  %p2459_p2 = por %p2458_p9, %p2457_p11 }
  0x3a   : > { %1456 = vst [vmem:[#allocation2 + $0xd8] sm:$0x1] %v2511_v0  ;;  %1872 = vmatmul.msk.bf16.vlgmr.msra.gmra.mxu0 %vm385_vm0, %v2252_v13  ;;  %1964 = vmatmul.msk.bf16.vlgmr.msra.gmra.mxu1 %vm385_vm0, %v2233_v14  ;;  %v2295_v36 = vld [vmem:[%s2637_s21 + $0x40] sm:$0xff]  ;;  %v2258_v37 = vld [vmem:[%s2637_s21 + $0x38] sm:$0xff]  ;;  %v2239_v38 = vld [vmem:[%s2637_s21 + $0x30] sm:$0xff]  ;;  %p2455_p8 = pneg %p2454_p4 }
  0x3b   : > { %1457 = vst [vmem:[#allocation2 + $0xf0] sm:$0x1] %v2511_v0  ;;  %2088 = vmatmul.msk.bf16.vlgmr.msra.gmra.mxu2 %vm385_vm0, %v2271_v15  ;;  %2212 = vmatmul.msk.bf16.vlgmr.msra.gmra.mxu3 %vm385_vm0, %v2290_v16  ;;  %v2277_v39 = vld [vmem:[%s2637_s21 + $0x40] sm:$0xff]  ;;  %v2296_v40 = vld [vmem:[%s2637_s21 + $0x48] sm:$0xff]  ;;  %v2240_v42 = vld [vmem:[%s2637_s21 + $0x38] sm:$0xff] }
  0x3c   : > { %1458 = vst [vmem:[#allocation2 + $0x108] sm:$0x1] %v2511_v0  ;;  %v2259_v41 = vld [vmem:[%s2637_s21 + $0x40] sm:$0xff]  ;;  %v2278_v43 = vld [vmem:[%s2637_s21 + $0x48] sm:$0xff]  ;;  %v2297_v44 = vld [vmem:[%s2637_s21 + $0x50] sm:$0xff]  ;;  %p2460_p10 = pnand %p2459_p2, %p2455_p8 }
  0x3d   : > { %1459 = vst [vmem:[#allocation2 + $0x120] sm:$0x1] %v2511_v0  ;;  %v2260_v45 = vld [vmem:[%s2637_s21 + $0x48] sm:$0xff]  ;;  %v2241_v46 = vld [vmem:[%s2637_s21 + $0x40] sm:$0xff]  ;;  %v2279_v49 = vld [vmem:[%s2637_s21 + $0x50] sm:$0xff] }
  0x3e   : > { %1460 = vst [vmem:[#allocation2 + $0x138] sm:$0x1] %v2511_v0  ;;  %v2298_v50 = vld [vmem:[%s2637_s21 + $0x58] sm:$0xff]  ;;  %v2242_v1 = vld [vmem:[%s2637_s21 + $0x48] sm:$0xff]  ;;  %v2299_v6 = vld [vmem:[%s2637_s21 + $0x60] sm:$0xff] }
  0x3f   : > { %1461 = vst [vmem:[#allocation2 + $0x150] sm:$0x1] %v2511_v0  ;;  %v2722_v55 = vld [vmem:[%s2867_s2] ss:$0 sm:$0xff] }
  0x40   : > { %1462 = vst [vmem:[#allocation2 + $0x168] sm:$0x1] %v2511_v0  ;;  %v2280_v5 = vld [vmem:[%s2637_s21 + $0x58] sm:$0xff] }
  0x41   : > { %1463 = vst [vmem:[#allocation2 + $0x180] sm:$0x1] %v2511_v0 }
  0x42   : > { %1447 = vst [vmem:[#allocation2] sm:$0x1] %v2511_v0  ;;  %v2261_v0 = vld [vmem:[%s2637_s21 + $0x50] sm:$0xff] }
  0x4a   : > { %1873 = vmatmul.msk.bf16.gmra.mxu0 %vm385_vm0, %v2253_v17  ;;  %1965 = vmatmul.msk.bf16.gmra.mxu1 %vm385_vm0, %v2234_v18 }
  0x4b   : > { %2089 = vmatmul.msk.bf16.gmra.mxu2 %vm385_vm0, %v2272_v19  ;;  %2213 = vmatmul.msk.bf16.gmra.mxu3 %vm385_vm0, %v2291_v20 }
  0x5a   : > { %1874 = vmatmul.msk.bf16.gmra.mxu0 %vm385_vm0, %v2254_v21  ;;  %1966 = vmatmul.msk.bf16.gmra.mxu1 %vm385_vm0, %v2235_v22  ;;  %v2262_v22 = vld [vmem:[%s2637_s21 + $0x58] sm:$0xff] }
  0x5b   : > { %2090 = vmatmul.msk.bf16.gmra.mxu2 %vm385_vm0, %v2273_v23  ;;  %2214 = vmatmul.msk.bf16.gmra.mxu3 %vm385_vm0, %v2292_v24  ;;  %v2243_v23 = vld [vmem:[%s2637_s21 + $0x50] sm:$0xff] }
  0x6a   : > { %1875 = vmatmul.msk.bf16.gmra.mxu0 %vm385_vm0, %v2255_v25  ;;  %1967 = vmatmul.msk.bf16.gmra.mxu1 %vm385_vm0, %v2236_v26 }
  0x6b   : > { %2091 = vmatmul.msk.bf16.gmra.mxu2 %vm385_vm0, %v2274_v27  ;;  %2215 = vmatmul.msk.bf16.gmra.mxu3 %vm385_vm0, %v2293_v28  ;;  %v2281_v27 = vld [vmem:[%s2637_s21 + $0x60] sm:$0xff]  ;;  %v2300_v28 = vld [vmem:[%s2637_s21 + $0x68] sm:$0xff] }
  0x7a   : > { %1876 = vmatmul.msk.bf16.gmra.mxu0 %vm385_vm0, %v2256_v29  ;;  %1968 = vmatmul.msk.bf16.gmra.mxu1 %vm385_vm0, %v2237_v30 }
  0x7b   : > { %2092 = vmatmul.msk.bf16.gmra.mxu2 %vm385_vm0, %v2275_v31  ;;  %2216 = vmatmul.msk.bf16.gmra.mxu3 %vm385_vm0, %v2294_v32  ;;  %v1498_v32 = vld [vmem:[#allocation2] ss:$2 sm:$0xff] }
  0x8a   : > { %1877 = vmatmul.msk.bf16.gmra.mxu0 %vm385_vm0, %v2257_v33  ;;  %1969 = vmatmul.msk.bf16.gmra.mxu1 %vm385_vm0, %v2238_v34 }
  0x8b   : > { %2093 = vmatmul.msk.bf16.gmra.mxu2 %vm385_vm0, %v2276_v35  ;;  %2217 = vmatmul.msk.bf16.gmra.mxu3 %vm385_vm0, %v2295_v36  ;;  %v1532_v35 = vld [vmem:[#allocation2 + $0x1] ss:$2 sm:$0xff] }
  0x9a   : > { %1878 = vmatmul.msk.bf16.gmra.mxu0 %vm385_vm0, %v2258_v37  ;;  %1970 = vmatmul.msk.bf16.gmra.mxu1 %vm385_vm0, %v2239_v38 }
  0x9b   : > { %2094 = vmatmul.msk.bf16.gmra.mxu2 %vm385_vm0, %v2277_v39  ;;  %2218 = vmatmul.msk.bf16.gmra.mxu3 %vm385_vm0, %v2296_v40 }
  0xaa   : > { %1879 = vmatmul.msk.bf16.gmra.mxu0 %vm385_vm0, %v2259_v41  ;;  %1971 = vmatmul.msk.bf16.gmra.mxu1 %vm385_vm0, %v2240_v42  ;;  %v1565_v42 = vmax.f32 %v1498_v32, %v1532_v35 }
  0xab   : > { %2095 = vmatmul.msk.bf16.gmra.mxu2 %vm385_vm0, %v2278_v43  ;;  %2219 = vmatmul.msk.bf16.gmra.mxu3 %vm385_vm0, %v2297_v44 }
  0xb7   : > { %v443_v47 = vpop.f32.mrf.mxu0  ;;  %v678_v48 = vpop.f32.mrf.mxu1 }
  0xb8   : > { %v679_v51 = vadd.f32 %v678_v48, %v443_v47 }
  0xba   : > { %1880 = vmatmul.msk.bf16.gmra.mxu0 %vm385_vm0, %v2260_v45  ;;  %1972 = vmatmul.msk.bf16.gmra.mxu1 %vm385_vm0, %v2241_v46  ;;  %v1583_v45 = vld [vmem:[#allocation2 + $0x2] ss:$2 sm:$0xff] }
  0xbb   : > { %2096 = vmatmul.msk.bf16.gmra.mxu2 %vm385_vm0, %v2279_v49  ;;  %2220 = vmatmul.msk.bf16.gmra.mxu3 %vm385_vm0, %v2298_v50  ;;  %v1616_v48 = vmax.f32 %v1565_v42, %v1583_v45  ;;  %v2265_v45 = vld [vmem:[%s2637_s21 + $0x70] sm:$0xff] }
  0xbe   : > { %v953_v52 = vpop.f32.mrf.mxu2  ;;  %v1260_v53 = vpop.f32.mrf.mxu3 }
  0xbf   : > { %v1033_v54 = vadd.f32 %v953_v52, %v679_v51  ;;  %v445_v56 = vpop.f32.mrf.mxu0  ;;  %v680_v57 = vpop.f32.mrf.mxu1  ;;  %v2263_v52 = vld [vmem:[%s2637_s21 + $0x60] sm:$0xff] }
  0xc0   : > { %v681_v61 = vadd.f32 %v680_v57, %v445_v56 }
  0xc1   : > { %v1340_v58 = vadd.f32 %v1260_v53, %v1033_v54 }
  0xc3   : > { %v1376_v59 = vadd.f32 %v2722_v55, %v1340_v58  ;;  %v2244_v58 = vld [vmem:[%s2637_s21 + $0x58] sm:$0xff] }
  0xc5   : > { %v1408_v60 = vmax.f32 %v1376_v59, 0.0 }
  0xc6   : > { %v955_v62 = vpop.f32.mrf.mxu2  ;;  %v1262_v63 = vpop.f32.mrf.mxu3 }
  0xc7   : > { %1466 = vst [vmem:[#allocation2 + $0x19] sm:$0xff] %v1408_v60  ;;  %v1034_v2 = vadd.f32 %v955_v62, %v681_v61  ;;  %v448_v3 = vpop.f32.mrf.mxu0  ;;  %v683_v4 = vpop.f32.mrf.mxu1 }
  0xc8   : > { %v684_v9 = vadd.f32 %v683_v4, %v448_v3 }
  0xc9   : > { %v1341_v7 = vadd.f32 %v1262_v63, %v1034_v2  ;;  %v2282_v63 = vld [vmem:[%s2637_s21 + $0x68] sm:$0xff] }
  0xca   : > { %1881 = vmatmul.msk.bf16.gmra.mxu0 %vm385_vm0, %v2261_v0  ;;  %1973 = vmatmul.msk.bf16.gmra.mxu1 %vm385_vm0, %v2242_v1  ;;  %v2301_v0 = vld [vmem:[%s2637_s21 + $0x70] sm:$0xff] }
  0xcb   : > { %v1377_v8 = vadd.f32 %v2722_v55, %v1341_v7  ;;  %2097 = vmatmul.msk.bf16.gmra.mxu2 %vm385_vm0, %v2280_v5  ;;  %2221 = vmatmul.msk.bf16.gmra.mxu3 %vm385_vm0, %v2299_v6 }
  0xcd   : > { %v1409_v10 = vmax.f32 %v1377_v8, 0.0 }
  0xce   : > { %v958_v11 = vpop.f32.mrf.mxu2  ;;  %v1265_v12 = vpop.f32.mrf.mxu3 }
  0xcf   : > { %1467 = vst [vmem:[#allocation2 + $0x21] sm:$0xff] %v1409_v10  ;;  %v1035_v13 = vadd.f32 %v958_v11, %v684_v9  ;;  %v450_v14 = vpop.f32.mrf.mxu0  ;;  %v685_v15 = vpop.f32.mrf.mxu1 }
  0xd0   : > { %v686_v19 = vadd.f32 %v685_v15, %v450_v14 }
  0xd1   : > { %v1342_v16 = vadd.f32 %v1265_v12, %v1035_v13 }
  0xd3   : > { %v1378_v17 = vadd.f32 %v2722_v55, %v1342_v16 }
  0xd5   : > { %v1410_v18 = vmax.f32 %v1378_v17, 0.0 }
  0xd6   : > { %v960_v20 = vpop.f32.mrf.mxu2  ;;  %v1267_v21 = vpop.f32.mrf.mxu3  ;;  %v1500_v34 = vld [vmem:[#allocation2 + $0x18] ss:$2 sm:$0xff]  ;;  %v1534_v36 = vld [vmem:[#allocation2 + $0x19] ss:$2 sm:$0xff] }
  0xd7   : > { %1468 = vst [vmem:[#allocation2 + $0x31] sm:$0xff] %v1410_v18  ;;  %v1036_v24 = vadd.f32 %v960_v20, %v686_v19  ;;  %v453_v25 = vpop.f32.mrf.mxu0  ;;  %v688_v26 = vpop.f32.mrf.mxu1  ;;  %v1566_v43 = vmax.f32 %v1500_v34, %v1534_v36  ;;  %v1585_v47 = vld [vmem:[#allocation2 + $0x1a] ss:$2 sm:$0xff] }
  0xd8   : > { %v689_v31 = vadd.f32 %v688_v26, %v453_v25  ;;  %v2264_v20 = vld [vmem:[%s2637_s21 + $0x68] sm:$0xff]  ;;  %v2283_v25 = vld [vmem:[%s2637_s21 + $0x70] sm:$0xff]  ;;  %v2302_v26 = vld [vmem:[%s2637_s21 + $0x78] sm:$0xff] }
  0xd9   : > { %v1343_v29 = vadd.f32 %v1267_v21, %v1036_v24  ;;  %v1617_v49 = vmax.f32 %v1566_v43, %v1585_v47  ;;  %v2245_v21 = vld [vmem:[%s2637_s21 + $0x60] sm:$0xff] }
  0xda   : > { %1882 = vmatmul.msk.bf16.gmra.mxu0 %vm385_vm0, %v2262_v22  ;;  %1974 = vmatmul.msk.bf16.gmra.mxu1 %vm385_vm0, %v2243_v23 }
  0xdb   : > { %v1379_v30 = vadd.f32 %v2722_v55, %v1343_v29  ;;  %2098 = vmatmul.msk.bf16.gmra.mxu2 %vm385_vm0, %v2281_v27  ;;  %2222 = vmatmul.msk.bf16.gmra.mxu3 %vm385_vm0, %v2300_v28  ;;  %v1633_v2 = vmax.f32 %v1616_v48, %v1617_v49 }
  0xdd   : > { %v1411_v33 = vmax.f32 %v1379_v30, 0.0 }
  0xde   : > { %v963_v37 = vpop.f32.mrf.mxu2  ;;  %v1270_v38 = vpop.f32.mrf.mxu3 }
  0xdf   : > { %1469 = vst [vmem:[#allocation2 + $0x39] sm:$0xff] %v1411_v33  ;;  %v1037_v39 = vadd.f32 %v963_v37, %v689_v31  ;;  %v455_v40 = vpop.f32.mrf.mxu0  ;;  %v690_v41 = vpop.f32.mrf.mxu1 }
  0xe0   : > { %v691_v51 = vadd.f32 %v690_v41, %v455_v40 }
  0xe1   : > { %v1344_v44 = vadd.f32 %v1270_v38, %v1037_v39 }
  0xe3   : > { %v1380_v46 = vadd.f32 %v2722_v55, %v1344_v44 }
  0xe5   : > { %v1412_v50 = vmax.f32 %v1380_v46, 0.0 }
  0xe6   : > { %v1502_v53 = vld [vmem:[#allocation2 + $0x30] ss:$2 sm:$0xff]  ;;  %v1536_v54 = vld [vmem:[#allocation2 + $0x31] ss:$2 sm:$0xff]  ;;  %v965_v56 = vpop.f32.mrf.mxu2  ;;  %v1272_v57 = vpop.f32.mrf.mxu3 }
  0xe7   : > { %v1567_v59 = vmax.f32 %v1502_v53, %v1536_v54  ;;  %1470 = vst [vmem:[#allocation2 + $0x49] sm:$0xff] %v1412_v50  ;;  %v1038_v60 = vadd.f32 %v965_v56, %v691_v51  ;;  %v458_v61 = vpop.f32.mrf.mxu0  ;;  %v693_v62 = vpop.f32.mrf.mxu1  ;;  %v1587_v1 = vld [vmem:[#allocation2 + $0x32] ss:$2 sm:$0xff] }
  0xe8   : > { %v694_v7 = vadd.f32 %v693_v62, %v458_v61  ;;  %v2246_v50 = vld [vmem:[%s2637_s21 + $0x68] sm:$0xff]  ;;  %v2284_v56 = vld [vmem:[%s2637_s21 + $0x78] sm:$0xff] }
  0xe9   : > { %v2750_v3 = vmax.f32 %v1567_v59, %v1587_v1  ;;  %v1345_v4 = vadd.f32 %v1272_v57, %v1038_v60  ;;  %v2303_v57 = vld [vmem:[%s2637_s21 + $0x80] sm:$0xff] }
  0xea   : > { %1883 = vmatmul.msk.bf16.gmra.mxu0 %vm385_vm0, %v2263_v52  ;;  %1975 = vmatmul.msk.bf16.gmra.mxu1 %vm385_vm0, %v2244_v58 }
  0xeb   : > { %v1641_v5 = vmax.f32 %v1633_v2, %v2750_v3  ;;  %v1381_v6 = vadd.f32 %v2722_v55, %v1345_v4  ;;  %2099 = vmatmul.msk.bf16.gmra.mxu2 %vm385_vm0, %v2282_v63  ;;  %2223 = vmatmul.msk.bf16.gmra.mxu3 %vm385_vm0, %v2301_v0 }
  0xed   : > { %1649 = vst [vmem:[%s2758_s17] sm:$0xff] %v1641_v5  ;;  %v1413_v8 = vmax.f32 %v1381_v6, 0.0 }
  0xee   : > { %v968_v9 = vpop.f32.mrf.mxu2  ;;  %v1275_v10 = vpop.f32.mrf.mxu3 }
  0xef   : > { %1471 = vst [vmem:[#allocation2 + $0x51] sm:$0xff] %v1413_v8  ;;  %v1039_v11 = vadd.f32 %v968_v9, %v694_v7  ;;  %v460_v12 = vpop.f32.mrf.mxu0  ;;  %v695_v13 = vpop.f32.mrf.mxu1 }
  0xf0   : > { %v696_v17 = vadd.f32 %v695_v13, %v460_v12  ;;  %v2266_v13 = vld [vmem:[%s2637_s21 + $0x78] sm:$0xff] }
  0xf1   : > { %v1346_v14 = vadd.f32 %v1275_v10, %v1039_v11 }
  0xf3   : > { %v1382_v15 = vadd.f32 %v2722_v55, %v1346_v14  ;;  %v2247_v14 = vld [vmem:[%s2637_s21 + $0x70] sm:$0xff] }
  0xf5   : > { %v1414_v16 = vmax.f32 %v1382_v15, 0.0 }
  0xf6   : > { %v970_v18 = vpop.f32.mrf.mxu2  ;;  %v1277_v19 = vpop.f32.mrf.mxu3  ;;  %v1504_v31 = vld [vmem:[#allocation2 + $0x48] ss:$2 sm:$0xff]  ;;  %v1538_v32 = vld [vmem:[#allocation2 + $0x49] ss:$2 sm:$0xff] }
  0xf7   : > { %1472 = vst [vmem:[#allocation2 + $0x61] sm:$0xff] %v1414_v16  ;;  %v1040_v22 = vadd.f32 %v970_v18, %v696_v17  ;;  %v463_v23 = vpop.f32.mrf.mxu0  ;;  %v698_v24 = vpop.f32.mrf.mxu1  ;;  %v1568_v38 = vmax.f32 %v1504_v31, %v1538_v32  ;;  %v1589_v41 = vld [vmem:[#allocation2 + $0x4a] ss:$2 sm:$0xff] }
  0xf8   : > { %v699_v29 = vadd.f32 %v698_v24, %v463_v23  ;;  %v2285_v18 = vld [vmem:[%s2637_s21 + $0x80] sm:$0xff] }
  0xf9   : > { %v1347_v27 = vadd.f32 %v1277_v19, %v1040_v22  ;;  %v1619_v42 = vmax.f32 %v1568_v38, %v1589_v41  ;;  %v2304_v19 = vld [vmem:[%s2637_s21 + $0x88] sm:$0xff]  ;;  %v2267_v38 = vld [vmem:[%s2637_s21 + $0x80] sm:$0xff] }
  0xfa   : > { %1884 = vmatmul.msk.bf16.gmra.mxu0 %vm385_vm0, %v2264_v20  ;;  %1976 = vmatmul.msk.bf16.gmra.mxu1 %vm385_vm0, %v2245_v21 }
  0xfb   : > { %v1383_v28 = vadd.f32 %v2722_v55, %v1347_v27  ;;  %2100 = vmatmul.msk.bf16.gmra.mxu2 %vm385_vm0, %v2283_v25  ;;  %2224 = vmatmul.msk.bf16.gmra.mxu3 %vm385_vm0, %v2302_v26  ;;  %v1634_v59 = vmax.f32 %v2750_v3, %v1619_v42 }
  0xfd   : > { %v1415_v30 = vmax.f32 %v1383_v28, 0.0 }
  0xfe   : > { %v973_v33 = vpop.f32.mrf.mxu2  ;;  %v1280_v34 = vpop.f32.mrf.mxu3 }
  0xff   : > { %1473 = vst [vmem:[#allocation2 + $0x69] sm:$0xff] %v1415_v30  ;;  %v1041_v35 = vadd.f32 %v973_v33, %v699_v29  ;;  %v465_v36 = vpop.f32.mrf.mxu0  ;;  %v700_v37 = vpop.f32.mrf.mxu1 }
 0x100   : > { %v701_v44 = vadd.f32 %v700_v37, %v465_v36 }
 0x101   : > { %v1348_v39 = vadd.f32 %v1280_v34, %v1041_v35 }
 0x103   : > { %v1384_v40 = vadd.f32 %v2722_v55, %v1348_v39 }
 0x105   : > { %v1416_v43 = vmax.f32 %v1384_v40, 0.0 }
 0x106   : > { %v1506_v46 = vld [vmem:[#allocation2 + $0x60] ss:$2 sm:$0xff]  ;;  %v1540_v47 = vld [vmem:[#allocation2 + $0x61] ss:$2 sm:$0xff]  ;;  %v975_v48 = vpop.f32.mrf.mxu2  ;;  %v1282_v49 = vpop.f32.mrf.mxu3 }
 0x107   : > { %v1569_v51 = vmax.f32 %v1506_v46, %v1540_v47  ;;  %1474 = vst [vmem:[#allocation2 + $0x79] sm:$0xff] %v1416_v43  ;;  %v1042_v52 = vadd.f32 %v975_v48, %v701_v44  ;;  %v468_v53 = vpop.f32.mrf.mxu0  ;;  %v703_v54 = vpop.f32.mrf.mxu1  ;;  %v1591_v58 = vld [vmem:[#allocation2 + $0x62] ss:$2 sm:$0xff] }
 0x108   : > { %v704_v0 = vadd.f32 %v703_v54, %v468_v53  ;;  %v2248_v43 = vld [vmem:[%s2637_s21 + $0x78] sm:$0xff]  ;;  %v2286_v48 = vld [vmem:[%s2637_s21 + $0x88] sm:$0xff] }
 0x109   : > { %v2777_v60 = vmax.f32 %v1569_v51, %v1591_v58  ;;  %v1349_v61 = vadd.f32 %v1282_v49, %v1042_v52  ;;  %v2305_v49 = vld [vmem:[%s2637_s21 + $0x90] sm:$0xff] }
 0x10a   : > { %1885 = vmatmul.msk.bf16.gmra.mxu0 %vm385_vm0, %v2265_v45  ;;  %1977 = vmatmul.msk.bf16.gmra.mxu1 %vm385_vm0, %v2246_v50 }
 0x10b   : > { %v1642_v62 = vmax.f32 %v1634_v59, %v2777_v60  ;;  %v1385_v63 = vadd.f32 %v2722_v55, %v1349_v61  ;;  %2101 = vmatmul.msk.bf16.gmra.mxu2 %vm385_vm0, %v2284_v56  ;;  %2225 = vmatmul.msk.bf16.gmra.mxu3 %vm385_vm0, %v2303_v57 }
 0x10d   : > { %1650 = vst [vmem:[%s2758_s17 + $0x8] sm:$0xff] %v1642_v62  ;;  %v1417_v1 = vmax.f32 %v1385_v63, 0.0 }
 0x10e   : > { %v978_v2 = vpop.f32.mrf.mxu2  ;;  %v1285_v3 = vpop.f32.mrf.mxu3 }
 0x10f   : > { %1475 = vst [vmem:[#allocation2 + $0x81] sm:$0xff] %v1417_v1  ;;  %v1043_v4 = vadd.f32 %v978_v2, %v704_v0  ;;  %v470_v5 = vpop.f32.mrf.mxu0  ;;  %v705_v6 = vpop.f32.mrf.mxu1 }
 0x110   : > { %v706_v10 = vadd.f32 %v705_v6, %v470_v5 }
 0x111   : > { %v1350_v7 = vadd.f32 %v1285_v3, %v1043_v4 }
 0x113   : > { %v1386_v8 = vadd.f32 %v2722_v55, %v1350_v7 }
 0x115   : > { %v1418_v9 = vmax.f32 %v1386_v8, 0.0 }
 0x116   : > { %v980_v11 = vpop.f32.mrf.mxu2  ;;  %v1287_v12 = vpop.f32.mrf.mxu3  ;;  %v1508_v24 = vld [vmem:[#allocation2 + $0x78] ss:$2 sm:$0xff]  ;;  %v1542_v25 = vld [vmem:[#allocation2 + $0x79] ss:$2 sm:$0xff] }
 0x117   : > { %1476 = vst [vmem:[#allocation2 + $0x91] sm:$0xff] %v1418_v9  ;;  %v1044_v15 = vadd.f32 %v980_v11, %v706_v10  ;;  %v473_v16 = vpop.f32.mrf.mxu0  ;;  %v708_v17 = vpop.f32.mrf.mxu1  ;;  %v1570_v31 = vmax.f32 %v1508_v24, %v1542_v25  ;;  %v1593_v34 = vld [vmem:[#allocation2 + $0x7a] ss:$2 sm:$0xff] }
 0x118   : > { %v709_v22 = vadd.f32 %v708_v17, %v473_v16 }
 0x119   : > { %v1351_v20 = vadd.f32 %v1287_v12, %v1044_v15  ;;  %v1621_v35 = vmax.f32 %v1570_v31, %v1593_v34 }
 0x11a   : > { %1886 = vmatmul.msk.bf16.gmra.mxu0 %vm385_vm0, %v2266_v13  ;;  %1978 = vmatmul.msk.bf16.gmra.mxu1 %vm385_vm0, %v2247_v14 }
 0x11b   : > { %v1387_v21 = vadd.f32 %v2722_v55, %v1351_v20  ;;  %2102 = vmatmul.msk.bf16.gmra.mxu2 %vm385_vm0, %v2285_v18  ;;  %2226 = vmatmul.msk.bf16.gmra.mxu3 %vm385_vm0, %v2304_v19  ;;  %v1635_v51 = vmax.f32 %v2777_v60, %v1621_v35 }
 0x11d   : > { %v1419_v23 = vmax.f32 %v1387_v21, 0.0 }
 0x11e   : > { %v983_v26 = vpop.f32.mrf.mxu2  ;;  %v1290_v27 = vpop.f32.mrf.mxu3 }
 0x11f   : > { %1477 = vst [vmem:[#allocation2 + $0x99] sm:$0xff] %v1419_v23  ;;  %v1045_v28 = vadd.f32 %v983_v26, %v709_v22  ;;  %v475_v29 = vpop.f32.mrf.mxu0  ;;  %v710_v30 = vpop.f32.mrf.mxu1 }
 0x120   : > { %v711_v37 = vadd.f32 %v710_v30, %v475_v29 }
 0x121   : > { %v1352_v32 = vadd.f32 %v1290_v27, %v1045_v28 }
 0x123   : > { %v1388_v33 = vadd.f32 %v2722_v55, %v1352_v32 }
 0x125   : > { %v1420_v36 = vmax.f32 %v1388_v33, 0.0 }
 0x126   : > { %v1510_v39 = vld [vmem:[#allocation2 + $0x90] ss:$2 sm:$0xff]  ;;  %v1544_v40 = vld [vmem:[#allocation2 + $0x91] ss:$2 sm:$0xff]  ;;  %v985_v41 = vpop.f32.mrf.mxu2  ;;  %v1292_v42 = vpop.f32.mrf.mxu3 }
 0x127   : > { %v1571_v44 = vmax.f32 %v1510_v39, %v1544_v40  ;;  %1478 = vst [vmem:[#allocation2 + $0xa9] sm:$0xff] %v1420_v36  ;;  %v1046_v45 = vadd.f32 %v985_v41, %v711_v37  ;;  %v478_v46 = vpop.f32.mrf.mxu0  ;;  %v713_v47 = vpop.f32.mrf.mxu1  ;;  %v1595_v50 = vld [vmem:[#allocation2 + $0x92] ss:$2 sm:$0xff] }
 0x128   : > { %v714_v57 = vadd.f32 %v713_v47, %v478_v46 }
 0x129   : > { %v1622_v52 = vmax.f32 %v1571_v44, %v1595_v50  ;;  %v1353_v53 = vadd.f32 %v1292_v42, %v1046_v45 }
 0x12a   : > { %1887 = vmatmul.msk.bf16.gmra.mxu0 %vm385_vm0, %v2267_v38  ;;  %1979 = vmatmul.msk.bf16.gmra.mxu1 %vm385_vm0, %v2248_v43 }
 0x12b   : > { %v1643_v54 = vmax.f32 %v1635_v51, %v1622_v52  ;;  %v1389_v56 = vadd.f32 %v2722_v55, %v1353_v53  ;;  %2103 = vmatmul.msk.bf16.gmra.mxu2 %vm385_vm0, %v2286_v48  ;;  %2227 = vmatmul.msk.bf16.gmra.mxu3 %vm385_vm0, %v2305_v49 }
 0x12d   : > { %1651 = vst [vmem:[%s2758_s17 + $0x10] sm:$0xff] %v1643_v54  ;;  %v1421_v58 = vmax.f32 %v1389_v56, 0.0 }
 0x12e   : > { %v988_v59 = vpop.f32.mrf.mxu2  ;;  %v1295_v61 = vpop.f32.mrf.mxu3 }
 0x12f   : > { %1479 = vst [vmem:[#allocation2 + $0xb1] sm:$0xff] %v1421_v58  ;;  %v1047_v60 = vadd.f32 %v988_v59, %v714_v57  ;;  %v480_v62 = vpop.f32.mrf.mxu0  ;;  %v715_v63 = vpop.f32.mrf.mxu1 }
 0x130   : > { %v716_v3 = vadd.f32 %v715_v63, %v480_v62 }
 0x131   : > { %v1354_v0 = vadd.f32 %v1295_v61, %v1047_v60 }
 0x133   : > { %v1390_v1 = vadd.f32 %v2722_v55, %v1354_v0 }
 0x135   : > { %v1422_v2 = vmax.f32 %v1390_v1, 0.0 }
 0x136   : > { %v990_v4 = vpop.f32.mrf.mxu2  ;;  %v1297_v5 = vpop.f32.mrf.mxu3  ;;  %v1512_v13 = vld [vmem:[#allocation2 + $0xa8] ss:$2 sm:$0xff]  ;;  %v1546_v14 = vld [vmem:[#allocation2 + $0xa9] ss:$2 sm:$0xff] }
 0x137   : > { %1480 = vst [vmem:[#allocation2 + $0xc1] sm:$0xff] %v1422_v2  ;;  %v1048_v6 = vadd.f32 %v990_v4, %v716_v3  ;;  %v483_v7 = vpop.f32.mrf.mxu0  ;;  %v718_v8 = vpop.f32.mrf.mxu1  ;;  %v1572_v20 = vmax.f32 %v1512_v13, %v1546_v14  ;;  %v1597_v23 = vld [vmem:[#allocation2 + $0xaa] ss:$2 sm:$0xff] }
 0x138   : > { %v719_v11 = vadd.f32 %v718_v8, %v483_v7 }
 0x139   : > { %v1355_v9 = vadd.f32 %v1297_v5, %v1048_v6  ;;  %v1623_v24 = vmax.f32 %v1572_v20, %v1597_v23 }
 0x13b   : > { %v1391_v10 = vadd.f32 %v2722_v55, %v1355_v9  ;;  %v1636_v36 = vmax.f32 %v1622_v52, %v1623_v24 }
 0x13d   : > { %v1423_v12 = vmax.f32 %v1391_v10, 0.0 }
 0x13e   : > { %v993_v15 = vpop.f32.mrf.mxu2  ;;  %v1300_v16 = vpop.f32.mrf.mxu3 }
 0x13f   : > { %1481 = vst [vmem:[#allocation2 + $0xc9] sm:$0xff] %v1423_v12  ;;  %v1049_v17 = vadd.f32 %v993_v15, %v719_v11  ;;  %v485_v18 = vpop.f32.mrf.mxu0  ;;  %v720_v19 = vpop.f32.mrf.mxu1 }
 0x140   : > { %v721_v26 = vadd.f32 %v720_v19, %v485_v18 }
 0x141   : > { %v1356_v21 = vadd.f32 %v1300_v16, %v1049_v17 }
 0x143   : > { %v1392_v22 = vadd.f32 %v2722_v55, %v1356_v21 }
 0x145   : > { %v1424_v25 = vmax.f32 %v1392_v22, 0.0 }
 0x146   : > { %v1514_v27 = vld [vmem:[#allocation2 + $0xc0] ss:$2 sm:$0xff]  ;;  %v1548_v28 = vld [vmem:[#allocation2 + $0xc1] ss:$2 sm:$0xff]  ;;  %v995_v29 = vpop.f32.mrf.mxu2  ;;  %v1302_v30 = vpop.f32.mrf.mxu3 }
 0x147   : > { %v1573_v31 = vmax.f32 %v1514_v27, %v1548_v28  ;;  %1482 = vst [vmem:[#allocation2 + $0xd9] sm:$0xff] %v1424_v25  ;;  %v1050_v32 = vadd.f32 %v995_v29, %v721_v26  ;;  %v488_v33 = vpop.f32.mrf.mxu0  ;;  %v723_v34 = vpop.f32.mrf.mxu1  ;;  %v1599_v35 = vld [vmem:[#allocation2 + $0xc2] ss:$2 sm:$0xff] }
 0x148   : > { %v724_v41 = vadd.f32 %v723_v34, %v488_v33 }
 0x149   : > { %v1624_v37 = vmax.f32 %v1573_v31, %v1599_v35  ;;  %v1357_v38 = vadd.f32 %v1302_v30, %v1050_v32 }
 0x14b   : > { %v1644_v39 = vmax.f32 %v1636_v36, %v1624_v37  ;;  %v1393_v40 = vadd.f32 %v2722_v55, %v1357_v38 }
 0x14d   : > { %1652 = vst [vmem:[%s2758_s17 + $0x18] sm:$0xff] %v1644_v39  ;;  %v1425_v42 = vmax.f32 %v1393_v40, 0.0 }
 0x14e   : > { %v998_v43 = vpop.f32.mrf.mxu2  ;;  %v1305_v44 = vpop.f32.mrf.mxu3 }
 0x14f   : > { %1483 = vst [vmem:[#allocation2 + $0xe1] sm:$0xff] %v1425_v42  ;;  %v1051_v45 = vadd.f32 %v998_v43, %v724_v41  ;;  %v490_v46 = vpop.f32.mrf.mxu0  ;;  %v725_v47 = vpop.f32.mrf.mxu1 }
 0x150   : > { %v726_v51 = vadd.f32 %v725_v47, %v490_v46 }
 0x151   : > { %v1358_v48 = vadd.f32 %v1305_v44, %v1051_v45 }
 0x153   : > { %v1394_v49 = vadd.f32 %v2722_v55, %v1358_v48 }
 0x155   : > { %v1426_v50 = vmax.f32 %v1394_v49, 0.0 }
 0x156   : > { %v1000_v52 = vpop.f32.mrf.mxu2  ;;  %v1307_v53 = vpop.f32.mrf.mxu3  ;;  %v1516_v62 = vld [vmem:[#allocation2 + $0xd8] ss:$2 sm:$0xff]  ;;  %v1550_v63 = vld [vmem:[#allocation2 + $0xd9] ss:$2 sm:$0xff] }
 0x157   : > { %1484 = vst [vmem:[#allocation2 + $0xf1] sm:$0xff] %v1426_v50  ;;  %v1052_v54 = vadd.f32 %v1000_v52, %v726_v51  ;;  %v493_v56 = vpop.f32.mrf.mxu0  ;;  %v728_v57 = vpop.f32.mrf.mxu1  ;;  %v1574_v5 = vmax.f32 %v1516_v62, %v1550_v63  ;;  %v1601_v8 = vld [vmem:[#allocation2 + $0xda] ss:$2 sm:$0xff] }
 0x158   : > { %v729_v61 = vadd.f32 %v728_v57, %v493_v56 }
 0x159   : > { %v1359_v58 = vadd.f32 %v1307_v53, %v1052_v54  ;;  %v1625_v9 = vmax.f32 %v1574_v5, %v1601_v8 }
 0x15b   : > { %v1395_v59 = vadd.f32 %v2722_v55, %v1359_v58  ;;  %v1637_v21 = vmax.f32 %v1624_v37, %v1625_v9 }
 0x15d   : > { %v1427_v60 = vmax.f32 %v1395_v59, 0.0 }
 0x15e   : > { %v1003_v0 = vpop.f32.mrf.mxu2  ;;  %v1310_v1 = vpop.f32.mrf.mxu3 }
 0x15f   : > { %1485 = vst [vmem:[#allocation2 + $0xf9] sm:$0xff] %v1427_v60  ;;  %v1053_v2 = vadd.f32 %v1003_v0, %v729_v61  ;;  %v495_v3 = vpop.f32.mrf.mxu0  ;;  %v730_v4 = vpop.f32.mrf.mxu1 }
 0x160   : > { %v731_v11 = vadd.f32 %v730_v4, %v495_v3 }
 0x161   : > { %v1360_v6 = vadd.f32 %v1310_v1, %v1053_v2 }
 0x163   : > { %v1396_v7 = vadd.f32 %v2722_v55, %v1360_v6 }
 0x165   : > { %v1428_v10 = vmax.f32 %v1396_v7, 0.0 }
 0x166   : > { %v1518_v12 = vld [vmem:[#allocation2 + $0xf0] ss:$2 sm:$0xff]  ;;  %v1552_v13 = vld [vmem:[#allocation2 + $0xf1] ss:$2 sm:$0xff]  ;;  %v1005_v14 = vpop.f32.mrf.mxu2  ;;  %v1312_v15 = vpop.f32.mrf.mxu3 }
 0x167   : > { %v1575_v16 = vmax.f32 %v1518_v12, %v1552_v13  ;;  %1486 = vst [vmem:[#allocation2 + $0x109] sm:$0xff] %v1428_v10  ;;  %v1054_v17 = vadd.f32 %v1005_v14, %v731_v11  ;;  %v498_v18 = vpop.f32.mrf.mxu0  ;;  %v733_v19 = vpop.f32.mrf.mxu1  ;;  %v1603_v20 = vld [vmem:[#allocation2 + $0xf2] ss:$2 sm:$0xff] }
 0x168   : > { %v734_v26 = vadd.f32 %v733_v19, %v498_v18 }
 0x169   : > { %v1626_v22 = vmax.f32 %v1575_v16, %v1603_v20  ;;  %v1361_v23 = vadd.f32 %v1312_v15, %v1054_v17 }
 0x16b   : > { %v1645_v24 = vmax.f32 %v1637_v21, %v1626_v22  ;;  %v1397_v25 = vadd.f32 %v2722_v55, %v1361_v23 }
 0x16d   : > { %1653 = vst [vmem:[%s2758_s17 + $0x20] sm:$0xff] %v1645_v24  ;;  %v1429_v27 = vmax.f32 %v1397_v25, 0.0 }
 0x16e   : > { %v1008_v28 = vpop.f32.mrf.mxu2  ;;  %v1315_v29 = vpop.f32.mrf.mxu3 }
 0x16f   : > { %1487 = vst [vmem:[#allocation2 + $0x111] sm:$0xff] %v1429_v27  ;;  %v1055_v30 = vadd.f32 %v1008_v28, %v734_v26  ;;  %v500_v31 = vpop.f32.mrf.mxu0  ;;  %v735_v32 = vpop.f32.mrf.mxu1 }
 0x170   : > { %v736_v36 = vadd.f32 %v735_v32, %v500_v31 }
 0x171   : > { %v1362_v33 = vadd.f32 %v1315_v29, %v1055_v30 }
 0x173   : > { %v1398_v34 = vadd.f32 %v2722_v55, %v1362_v33 }
 0x175   : > { %v1430_v35 = vmax.f32 %v1398_v34, 0.0 }
 0x176   : > { %v1010_v37 = vpop.f32.mrf.mxu2  ;;  %v1317_v38 = vpop.f32.mrf.mxu3  ;;  %v1520_v46 = vld [vmem:[#allocation2 + $0x108] ss:$2 sm:$0xff]  ;;  %v1554_v47 = vld [vmem:[#allocation2 + $0x109] ss:$2 sm:$0xff] }
 0x177   : > { %1488 = vst [vmem:[#allocation2 + $0x121] sm:$0xff] %v1430_v35  ;;  %v1056_v39 = vadd.f32 %v1010_v37, %v736_v36  ;;  %v503_v40 = vpop.f32.mrf.mxu0  ;;  %v738_v41 = vpop.f32.mrf.mxu1  ;;  %v1576_v53 = vmax.f32 %v1520_v46, %v1554_v47  ;;  %v1605_v57 = vld [vmem:[#allocation2 + $0x10a] ss:$2 sm:$0xff] }
 0x178   : > { %v739_v44 = vadd.f32 %v738_v41, %v503_v40 }
 0x179   : > { %v1363_v42 = vadd.f32 %v1317_v38, %v1056_v39  ;;  %v1627_v58 = vmax.f32 %v1576_v53, %v1605_v57 }
 0x17b   : > { %v1399_v43 = vadd.f32 %v2722_v55, %v1363_v42  ;;  %v1638_v6 = vmax.f32 %v1626_v22, %v1627_v58 }
 0x17d   : > { %v1431_v45 = vmax.f32 %v1399_v43, 0.0 }
 0x17e   : > { %v1013_v48 = vpop.f32.mrf.mxu2  ;;  %v1320_v49 = vpop.f32.mrf.mxu3 }
 0x17f   : > { %1489 = vst [vmem:[#allocation2 + $0x129] sm:$0xff] %v1431_v45  ;;  %v1057_v50 = vadd.f32 %v1013_v48, %v739_v44  ;;  %v505_v51 = vpop.f32.mrf.mxu0  ;;  %v740_v52 = vpop.f32.mrf.mxu1 }
 0x180   : > { %v741_v61 = vadd.f32 %v740_v52, %v505_v51 }
 0x181   : > { %v1364_v54 = vadd.f32 %v1320_v49, %v1057_v50 }
 0x183   : > { %v1400_v56 = vadd.f32 %v2722_v55, %v1364_v54 }
 0x185   : > { %v1432_v59 = vmax.f32 %v1400_v56, 0.0 }
 0x186   : > { %v1522_v60 = vld [vmem:[#allocation2 + $0x120] ss:$2 sm:$0xff]  ;;  %v1556_v62 = vld [vmem:[#allocation2 + $0x121] ss:$2 sm:$0xff]  ;;  %v1015_v63 = vpop.f32.mrf.mxu2  ;;  %v1322_v0 = vpop.f32.mrf.mxu3 }
 0x187   : > { %v1577_v1 = vmax.f32 %v1522_v60, %v1556_v62  ;;  %1490 = vst [vmem:[#allocation2 + $0x139] sm:$0xff] %v1432_v59  ;;  %v1058_v2 = vadd.f32 %v1015_v63, %v741_v61  ;;  %v508_v3 = vpop.f32.mrf.mxu0  ;;  %v743_v4 = vpop.f32.mrf.mxu1  ;;  %v1607_v5 = vld [vmem:[#allocation2 + $0x122] ss:$2 sm:$0xff] }
 0x188   : > { %v744_v11 = vadd.f32 %v743_v4, %v508_v3 }
 0x189   : > { %v1628_v7 = vmax.f32 %v1577_v1, %v1607_v5  ;;  %v1365_v8 = vadd.f32 %v1322_v0, %v1058_v2 }
 0x18b   : > { %v1646_v9 = vmax.f32 %v1638_v6, %v1628_v7  ;;  %v1401_v10 = vadd.f32 %v2722_v55, %v1365_v8 }
 0x18d   : > { %1654 = vst [vmem:[%s2758_s17 + $0x28] sm:$0xff] %v1646_v9  ;;  %v1433_v12 = vmax.f32 %v1401_v10, 0.0 }
 0x18e   : > { %v1018_v13 = vpop.f32.mrf.mxu2  ;;  %v1325_v14 = vpop.f32.mrf.mxu3 }
 0x18f   : > { %1491 = vst [vmem:[#allocation2 + $0x141] sm:$0xff] %v1433_v12  ;;  %v1059_v15 = vadd.f32 %v1018_v13, %v744_v11  ;;  %v510_v16 = vpop.f32.mrf.mxu0  ;;  %v745_v17 = vpop.f32.mrf.mxu1 }
 0x190   : > { %v746_v21 = vadd.f32 %v745_v17, %v510_v16 }
 0x191   : > { %v1366_v18 = vadd.f32 %v1325_v14, %v1059_v15 }
 0x193   : > { %v1402_v19 = vadd.f32 %v2722_v55, %v1366_v18 }
 0x195   : > { %v1434_v20 = vmax.f32 %v1402_v19, 0.0 }
 0x196   : > { %v1020_v22 = vpop.f32.mrf.mxu2  ;;  %v1327_v23 = vpop.f32.mrf.mxu3  ;;  %v1524_v31 = vld [vmem:[#allocation2 + $0x138] ss:$2 sm:$0xff]  ;;  %v1558_v32 = vld [vmem:[#allocation2 + $0x139] ss:$2 sm:$0xff] }
 0x197   : > { %1492 = vst [vmem:[#allocation2 + $0x151] sm:$0xff] %v1434_v20  ;;  %v1060_v24 = vadd.f32 %v1020_v22, %v746_v21  ;;  %v513_v25 = vpop.f32.mrf.mxu0  ;;  %v748_v26 = vpop.f32.mrf.mxu1  ;;  %v1578_v38 = vmax.f32 %v1524_v31, %v1558_v32  ;;  %v1609_v41 = vld [vmem:[#allocation2 + $0x13a] ss:$2 sm:$0xff] }
 0x198   : > { %v749_v29 = vadd.f32 %v748_v26, %v513_v25 }
 0x199   : > { %v1367_v27 = vadd.f32 %v1327_v23, %v1060_v24  ;;  %v1629_v42 = vmax.f32 %v1578_v38, %v1609_v41 }
 0x19b   : > { %v1403_v28 = vadd.f32 %v2722_v55, %v1367_v27  ;;  %v1639_v54 = vmax.f32 %v1628_v7, %v1629_v42 }
 0x19d   : > { %v1435_v30 = vmax.f32 %v1403_v28, 0.0 }
 0x19e   : > { %v1023_v33 = vpop.f32.mrf.mxu2  ;;  %v1330_v34 = vpop.f32.mrf.mxu3 }
 0x19f   : > { %1493 = vst [vmem:[#allocation2 + $0x159] sm:$0xff] %v1435_v30  ;;  %v1061_v35 = vadd.f32 %v1023_v33, %v749_v29  ;;  %v515_v36 = vpop.f32.mrf.mxu0  ;;  %v750_v37 = vpop.f32.mrf.mxu1 }
 0x1a0   : > { %v751_v44 = vadd.f32 %v750_v37, %v515_v36 }
 0x1a1   : > { %v1368_v39 = vadd.f32 %v1330_v34, %v1061_v35 }
 0x1a3   : > { %v1404_v40 = vadd.f32 %v2722_v55, %v1368_v39 }
 0x1a5   : > { %v1436_v43 = vmax.f32 %v1404_v40, 0.0 }
 0x1a6   : > { %v1526_v45 = vld [vmem:[#allocation2 + $0x150] ss:$2 sm:$0xff]  ;;  %v1560_v46 = vld [vmem:[#allocation2 + $0x151] ss:$2 sm:$0xff]  ;;  %v1025_v47 = vpop.f32.mrf.mxu2  ;;  %v1332_v48 = vpop.f32.mrf.mxu3 }
 0x1a7   : > { %v1579_v49 = vmax.f32 %v1526_v45, %v1560_v46  ;;  %1494 = vst [vmem:[#allocation2 + $0x169] sm:$0xff] %v1436_v43  ;;  %v1062_v50 = vadd.f32 %v1025_v47, %v751_v44  ;;  %v1611_v51 = vld [vmem:[#allocation2 + $0x152] ss:$2 sm:$0xff]  ;;  %v518_v52 = vpop.f32.mrf.mxu0  ;;  %v753_v53 = vpop.f32.mrf.mxu1 }
 0x1a8   : > { %v754_v61 = vadd.f32 %v753_v53, %v518_v52 }
 0x1a9   : > { %v1630_v56 = vmax.f32 %v1579_v49, %v1611_v51  ;;  %v1369_v57 = vadd.f32 %v1332_v48, %v1062_v50 }
 0x1ab   : > { %v1647_v58 = vmax.f32 %v1639_v54, %v1630_v56  ;;  %v1405_v59 = vadd.f32 %v2722_v55, %v1369_v57 }
 0x1ad   : > { %1655 = vst [vmem:[%s2758_s17 + $0x30] sm:$0xff] %v1647_v58  ;;  %v1437_v60 = vmax.f32 %v1405_v59, 0.0 }
 0x1ae   : > { %v1028_v62 = vpop.f32.mrf.mxu2  ;;  %v1335_v63 = vpop.f32.mrf.mxu3 }
 0x1af   : > { %1495 = vst [vmem:[#allocation2 + $0x171] sm:$0xff] %v1437_v60  ;;  %v1063_v0 = vadd.f32 %v1028_v62, %v754_v61  ;;  %v520_v2 = vpop.f32.mrf.mxu0  ;;  %v755_v3 = vpop.f32.mrf.mxu1 }
 0x1b0   : > { %v756_v6 = vadd.f32 %v755_v3, %v520_v2 }
 0x1b1   : > { %v1370_v1 = vadd.f32 %v1335_v63, %v1063_v0 }
 0x1b3   : > { %v1406_v4 = vadd.f32 %v2722_v55, %v1370_v1 }
 0x1b5   : > { %v1438_v5 = vmax.f32 %v1406_v4, 0.0 }
 0x1b6   : > { %v1030_v7 = vpop.f32.mrf.mxu2  ;;  %v1337_v9 = vpop.f32.mrf.mxu3  ;;  %v1528_v13 = vld [vmem:[#allocation2 + $0x168] ss:$2 sm:$0xff]  ;;  %v1562_v14 = vld [vmem:[#allocation2 + $0x169] ss:$2 sm:$0xff] }
 0x1b7   : > { %1496 = vst [vmem:[#allocation2 + $0x181] sm:$0xff] %v1438_v5  ;;  %v1064_v8 = vadd.f32 %v1030_v7, %v756_v6  ;;  %v1580_v15 = vmax.f32 %v1528_v13, %v1562_v14  ;;  %v1613_v16 = vld [vmem:[#allocation2 + $0x16a] ss:$2 sm:$0xff] }
 0x1b9   : > { %v1371_v10 = vadd.f32 %v1337_v9, %v1064_v8  ;;  %v1631_v17 = vmax.f32 %v1580_v15, %v1613_v16 }
 0x1bb   : > { %v1407_v11 = vadd.f32 %v2722_v55, %v1371_v10  ;;  %v1640_v21 = vmax.f32 %v1630_v56, %v1631_v17 }
 0x1bd   : > { %v1439_v12 = vmax.f32 %v1407_v11, 0.0 }
 0x1bf   : > { %1497 = vst [vmem:[#allocation2 + $0x189] sm:$0xff] %v1439_v12 }
 0x1c6   : > { %v1530_v18 = vld [vmem:[#allocation2 + $0x180] ss:$2 sm:$0xff]  ;;  %v1564_v19 = vld [vmem:[#allocation2 + $0x181] ss:$2 sm:$0xff] }
 0x1c7   : > { %v1581_v20 = vmax.f32 %v1530_v18, %v1564_v19  ;;  %v1615_v55 = vld [vmem:[#allocation2 + $0x182] ss:$2 sm:$0xff] }
 0x1c9   : > { %v1632_v22 = vmax.f32 %v1581_v20, %v1615_v55 }
 0x1cb   : > { %v1648_v23 = vmax.f32 %v1640_v21, %v1632_v22 }
 0x1cd   : > { %1656 = vst [vmem:[%s2758_s17 + $0x38] sm:$0xff] %v1648_v23 }
 0x1ce   : > { %2463 = shalt.err (!%p2460_p10)
}
 0x1cf   : > { %s2512_s8 = smov 128   ;;  %s2513_s18 = smov 8  }
 0x1d0   : > { %2319 = dma.vmem_to_hbm [thread:$0]  (%p2604_p7), %s1671_s29, 1024, %s1673_s30, %s1658_s16, %s2512_s8, %s2512_s8, %s2513_s18  }
 0x1d1 PF: > { %s1687_s23 = sand.u32 1, %s2494_s12   ;;  %p2876_p12 = scmp.ge.s32.totalorder %s2506_s15, 2 }
 0x1d2   : > { %s1688_s28 = scalar_lea.sflag [#allocation5], %s1687_s23 }
 0x1d3   : > { %p2330_p13 = pnand %p2876_p12, %p2569_p6 }
 0x1d5   : > { %p2331_p0 = pneg %p2330_p13 }
 0x1d7   : > { %2489 = dma.done.wait (%p2331_p0), %s1688_s28, 1024  }
 0x1d8   : > { %2491 = vsyncadd (%p2331_p0), %s1688_s28, 4294966272  ;;  %p17_p3 = scmp.ge.s32.totalorder %s2587_s26, 4   ;;  %s2877_s12 = smov %s2498_s13 }
 0x1d9   : > { %s2878_s13 = smov %s2502_s14  ;;  %s2879_s14 = smov %s2600_s4 }
 0x1da   : > { %s2880_s15 = smov %s2587_s26  ;;  %19 = sbr.rel (!%p17_p3) target bundleno = 6 (0x6), region = 139 }
 0x1df   :  { %1694 = vsyncpa [#allocation4], 1 }
 0x1e0   :  { %1696 = vsyncpa [#allocation4 + $0x1], 1 }
 0x1e1   :  { %1697 = vsyncpa [#allocation7], 1 }
 0x1e2   :  { %1698 = vsyncpa [#allocation5], 1 }
 0x1e3   :  { %1700 = vsyncpa [#allocation5 + $0x1], 1 }

</bundles_post_ra>
